<compile_context>
chip_gen: v7x
topology: tpu7x:2x2x1
jax: 0.10.0
libtpu: 0.0.40
codegen_flags: <defaults>
</compile_context>

<pallas_src>
import functools

import jax
import jax.numpy as jnp
from jax import lax
from jax.experimental import pallas as pl
from jax.experimental.pallas import tpu as pltpu

BN_EPS = 1e-5


def _conv_acc(x_ref, w_ref, *, s_ext, wpair, cin):
    """3x3 stride-(1,2) conv for one image as 9 shifted (M,Cin)@(Cin,Cpad) matmuls.

    x_ref: (1, R, 2*cin) — rows are flattened (h, w-pair); lanes [0,cin) hold the
           even-column channels, lanes [cin,2*cin) the odd-column channels.
    w_ref: (9, cin, Cpad) — per-tap weights, tap t = ki*3 + kj.
    Returns an (s_ext, Cpad) f32 accumulator where row s = ho*wpair + wo; the
    column wo == wpair-1 is padding/garbage and must be masked / discarded.
    """
    cpad = w_ref.shape[-1]
    acc = jnp.zeros((s_ext, cpad), jnp.float32)
    for ki in range(3):
        for kj in range(3):
            t = ki * 3 + kj
            base = ki * wpair + (1 if kj == 2 else 0)   # flat row offset (static)
            c0 = cin if kj == 1 else 0                  # even / odd column plane
            tap = x_ref[0, base:base + s_ext, c0:c0 + cin]        # (s_ext, cin)
            acc = acc + jnp.dot(tap, w_ref[t],
                                preferred_element_type=jnp.float32)
    return acc


def _stats_kernel(x_ref, w_ref, stats_ref, *, s_ext, wpair, wo, cin):
    """Pass 1: per-image per-channel sum and sum-of-squares of the conv output."""
    acc = _conv_acc(x_ref, w_ref, s_ext=s_ext, wpair=wpair, cin=cin)
    ridx = lax.broadcasted_iota(jnp.int32, (s_ext, 1), 0)
    valid = (ridx % wpair) < wo                # mask the padded wo column(s)
    accv = jnp.where(valid, acc, 0.0)
    stats_ref[0, 0:1, :] = jnp.sum(accv, axis=0, keepdims=True)
    stats_ref[0, 1:2, :] = jnp.sum(accv * accv, axis=0, keepdims=True)


def _bn_relu_kernel(x_ref, w_ref, scale_ref, shift_ref, o_ref, *, s_ext, wpair, cin):
    """Pass 2: recompute conv, apply folded BN (x*scale + shift) and ReLU."""
    acc = _conv_acc(x_ref, w_ref, s_ext=s_ext, wpair=wpair, cin=cin)
    y = acc * scale_ref[...] + shift_ref[...]           # single FMA-style pass
    o_ref[0, :, :] = jnp.maximum(y, 0.0).astype(o_ref.dtype)


def cbr_forward(x, weight, bias, gamma, beta):
    """x: (N, Cin, H, W) NCHW; weight: (Cout, Cin, 3, 3). Returns (N, Cout, Ho, Wo).

    `bias` is accepted for API parity but intentionally unused: training-mode
    BatchNorm subtracts the per-channel batch mean, which exactly cancels a
    per-channel conv bias, so adding it is wasted HBM/VPU work.
    """
    del bias
    N, Cin, H, W = x.shape
    Cout = weight.shape[0]
    kh, kw, sh, sw = 3, 3, 1, 2
    Ho = (H - kh) // sh + 1
    Wo = (W - kw) // sw + 1
    Wpair = Wo + 1                       # column pairs needed per image row
    Wpad = 2 * Wpair                     # even, >= W
    Cpad = 128 * pl.cdiv(Cout, 128)      # lane-dense output channels
    R = (H + 1) * Wpair                  # flattened input rows per image (+1 pad row)
    S = Ho * Wpair                       # extended output rows per image

    # --- one cheap layout pass over the input (no 9x im2col blow-up) ---
    xr = jnp.transpose(x, (0, 2, 3, 1)).astype(jnp.float32)      # (N, H, W, Cin)
    xr = jnp.pad(xr, ((0, 0), (0, 1), (0, Wpad - W), (0, 0)))    # (N, H+1, Wpad, Cin)
    xr = xr.reshape(N, H + 1, Wpair, 2 * Cin).reshape(N, R, 2 * Cin)

    # per-tap weight matrices, padded to a lane-dense Cout
    w_taps = jnp.transpose(weight, (2, 3, 1, 0)).reshape(9, Cin, Cout)
    w_taps = jnp.pad(w_taps.astype(jnp.float32),
                     ((0, 0), (0, 0), (0, Cpad - Cout)))          # (9, Cin, Cpad)

    x_spec = pl.BlockSpec((1, R, 2 * Cin), lambda n: (n, 0, 0))
    w_spec = pl.BlockSpec((9, Cin, Cpad), lambda n: (0, 0, 0))
    params = pltpu.CompilerParams(dimension_semantics=("parallel",))

    # --- pass 1: per-image per-channel sum / sum-of-squares ---
    stats = pl.pallas_call(
        functools.partial(_stats_kernel, s_ext=S, wpair=Wpair, wo=Wo, cin=Cin),
        out_shape=jax.ShapeDtypeStruct((N, 2, Cpad), jnp.float32),
        grid=(N,),
        in_specs=[x_spec, w_spec],
        out_specs=pl.BlockSpec((1, 2, Cpad), lambda n: (n, 0, 0)),
        compiler_params=params,
    )(xr, w_taps)

    # fold batch-statistics BN into per-channel scale/shift (tiny JAX math)
    count = N * Ho * Wo
    tot = jnp.sum(stats, axis=0)                                  # (2, Cpad)
    mean = tot[0] / count
    var = jnp.maximum(tot[1] / count - mean * mean, 0.0)          # biased variance
    gamma_p = jnp.pad(gamma.astype(jnp.float32), (0, Cpad - Cout))
    beta_p = jnp.pad(beta.astype(jnp.float32), (0, Cpad - Cout))
    scale = (gamma_p * lax.rsqrt(var + BN_EPS)).reshape(1, Cpad)
    shift = (beta_p - mean * scale[0]).reshape(1, Cpad)

    # --- pass 2: recompute conv, apply scale/shift + ReLU, lane-dense stores ---
    y_ext = pl.pallas_call(
        functools.partial(_bn_relu_kernel, s_ext=S, wpair=Wpair, cin=Cin),
        out_shape=jax.ShapeDtypeStruct((N, S, Cpad), jnp.float32),
        grid=(N,),
        in_specs=[x_spec, w_spec,
                  pl.BlockSpec((1, Cpad), lambda n: (0, 0)),
                  pl.BlockSpec((1, Cpad), lambda n: (0, 0))],
        out_specs=pl.BlockSpec((1, S, Cpad), lambda n: (n, 0, 0)),
        compiler_params=params,
    )(xr, w_taps, scale, shift)

    # tiny slice + transpose back to NCHW to match the PyTorch module's layout
    y = y_ext.reshape(N, Ho, Wpair, Cpad)[:, :, :Wo, :Cout]
    return jnp.transpose(y, (0, 3, 1, 2))


def _reference(x, weight, bias, gamma, beta):
    """Pure-JAX reference matching PyTorch CBR.forward in training mode."""
    y = lax.conv_general_dilated(
        x, weight, window_strides=(1, 2), padding="VALID",
        dimension_numbers=("NCHW", "OIHW", "NCHW"),
        precision=lax.Precision.HIGHEST)
    y = y + bias.reshape(1, -1, 1, 1)
    mean = jnp.mean(y, axis=(0, 2, 3), keepdims=True)
    var = jnp.mean((y - mean) ** 2, axis=(0, 2, 3), keepdims=True)
    yn = (y - mean) * lax.rsqrt(var + BN_EPS)
    yn = yn * gamma.reshape(1, -1, 1, 1) + beta.reshape(1, -1, 1, 1)
    return jnp.maximum(yn, 0.0)


if __name__ == "__main__":
    key = jax.random.PRNGKey(0)
    k_x, k_w, k_b, k_g, k_be = jax.random.split(key, 5)

    N, Cin, Cout, H, W = 2, 4, 8, 16, 16
    x = jax.random.normal(k_x, (N, Cin, H, W), dtype=jnp.float32)
    weight = jax.random.normal(k_w, (Cout, Cin, 3, 3), dtype=jnp.float32) * 0.1
    bias = jax.random.normal(k_b, (Cout,), dtype=jnp.float32) * 0.1
    gamma = 1.0 + 0.1 * jax.random.normal(k_g, (Cout,), dtype=jnp.float32)
    beta = 0.1 * jax.random.normal(k_be, (Cout,), dtype=jnp.float32)

    out = cbr_forward(x, weight, bias, gamma, beta)
    out = jax.block_until_ready(out)

    ref = _reference(x, weight, bias, gamma, beta)
    assert out.shape == (N, Cout, H - 2, (W - 3) // 2 + 1)
    # expected mismatch is ~1e-5 (bias cancellation + one-pass variance);
    # tolerance leaves headroom for MXU f32 accumulation differences.
    assert jnp.allclose(out, ref, atol=2e-3, rtol=2e-3)

    print("KERNEL_OK")
</pallas_src>

<mosaic_0001>
module attributes {stable_mosaic.version = 11 : i64} {
  func.func @_stats_kernel(%arg0: i32, %arg1: memref<1x136x8xf32, #tpu.memory_space<vmem>>, %arg2: memref<9x4x128xf32, #tpu.memory_space<vmem>>, %arg3: memref<1x2x128xf32, #tpu.memory_space<vmem>>) attributes {dimension_semantics = [#tpu.dimension_semantics<parallel>], iteration_bounds = array<i64: 2>, scalar_prefetch = 0 : i64, scratch_operands = 0 : i64, tpu.core_type = #tpu.core_type<tc>, window_params = [{transform_indices = @transform_0, window_bounds = array<i64: 1, 136, 8>}, {pipeline_mode = #tpu.pipeline_mode<synchronous>, transform_indices = @transform_1, window_bounds = array<i64: 9, 4, 128>}, {transform_indices = @transform_2, window_bounds = array<i64: 1, 2, 128>}]} {
    %cst = arith.constant 0.000000e+00 : f32
    %0 = vector.broadcast %cst : f32 to vector<112x128xf32>
    %c0 = arith.constant 0 : index
    %c0_0 = arith.constant 0 : index
    %c0_1 = arith.constant 0 : index
    %1 = vector.load %arg1[%c0, %c0_0, %c0_1] : memref<1x136x8xf32, #tpu.memory_space<vmem>>, vector<1x112x4xf32>
    %2 = vector.shape_cast %1 : vector<1x112x4xf32> to vector<112x4xf32>
    %c0_2 = arith.constant 0 : index
    %c0_3 = arith.constant 0 : index
    %c0_4 = arith.constant 0 : index
    %3 = vector.load %arg2[%c0_2, %c0_3, %c0_4] : memref<9x4x128xf32, #tpu.memory_space<vmem>>, vector<1x4x128xf32>
    %4 = vector.shape_cast %3 : vector<1x4x128xf32> to vector<4x128xf32>
    %cst_5 = arith.constant dense<0.000000e+00> : vector<112x128xf32>
    %5 = tpu.matmul %2, %4, %cst_5 {dimension_numbers = #tpu.dot_dimension_numbers<[1], [0], [0], [1], [0, 0, 1, 1], [], []>} : vector<112x4xf32>, vector<4x128xf32>, vector<112x128xf32> -> vector<112x128xf32>
    %6 = arith.addf %0, %5 : vector<112x128xf32>
    %c0_6 = arith.constant 0 : index
    %c0_7 = arith.constant 0 : index
    %c4 = arith.constant 4 : index
    %7 = vector.load %arg1[%c0_6, %c0_7, %c4] : memref<1x136x8xf32, #tpu.memory_space<vmem>>, vector<1x112x4xf32>
    %8 = vector.shape_cast %7 : vector<1x112x4xf32> to vector<112x4xf32>
    %c1 = arith.constant 1 : index
    %c0_8 = arith.constant 0 : index
    %c0_9 = arith.constant 0 : index
    %9 = vector.load %arg2[%c1, %c0_8, %c0_9] : memref<9x4x128xf32, #tpu.memory_space<vmem>>, vector<1x4x128xf32>
    %10 = vector.shape_cast %9 : vector<1x4x128xf32> to vector<4x128xf32>
    %cst_10 = arith.constant dense<0.000000e+00> : vector<112x128xf32>
    %11 = tpu.matmul %8, %10, %cst_10 {dimension_numbers = #tpu.dot_dimension_numbers<[1], [0], [0], [1], [0, 0, 1, 1], [], []>} : vector<112x4xf32>, vector<4x128xf32>, vector<112x128xf32> -> vector<112x128xf32>
    %12 = arith.addf %6, %11 : vector<112x128xf32>
    %c0_11 = arith.constant 0 : index
    %c1_12 = arith.constant 1 : index
    %c0_13 = arith.constant 0 : index
    %13 = vector.load %arg1[%c0_11, %c1_12, %c0_13] : memref<1x136x8xf32, #tpu.memory_space<vmem>>, vector<1x112x4xf32>
    %14 = vector.shape_cast %13 : vector<1x112x4xf32> to vector<112x4xf32>
    %c2 = arith.constant 2 : index
    %c0_14 = arith.constant 0 : index
    %c0_15 = arith.constant 0 : index
    %15 = vector.load %arg2[%c2, %c0_14, %c0_15] : memref<9x4x128xf32, #tpu.memory_space<vmem>>, vector<1x4x128xf32>
    %16 = vector.shape_cast %15 : vector<1x4x128xf32> to vector<4x128xf32>
    %cst_16 = arith.constant dense<0.000000e+00> : vector<112x128xf32>
    %17 = tpu.matmul %14, %16, %cst_16 {dimension_numbers = #tpu.dot_dimension_numbers<[1], [0], [0], [1], [0, 0, 1, 1], [], []>} : vector<112x4xf32>, vector<4x128xf32>, vector<112x128xf32> -> vector<112x128xf32>
    %18 = arith.addf %12, %17 : vector<112x128xf32>
    %c0_17 = arith.constant 0 : index
    %c8 = arith.constant 8 : index
    %c0_18 = arith.constant 0 : index
    %19 = vector.load %arg1[%c0_17, %c8, %c0_18] : memref<1x136x8xf32, #tpu.memory_space<vmem>>, vector<1x112x4xf32>
    %20 = vector.shape_cast %19 : vector<1x112x4xf32> to vector<112x4xf32>
    %c3 = arith.constant 3 : index
    %c0_19 = arith.constant 0 : index
    %c0_20 = arith.constant 0 : index
    %21 = vector.load %arg2[%c3, %c0_19, %c0_20] : memref<9x4x128xf32, #tpu.memory_space<vmem>>, vector<1x4x128xf32>
    %22 = vector.shape_cast %21 : vector<1x4x128xf32> to vector<4x128xf32>
    %cst_21 = arith.constant dense<0.000000e+00> : vector<112x128xf32>
    %23 = tpu.matmul %20, %22, %cst_21 {dimension_numbers = #tpu.dot_dimension_numbers<[1], [0], [0], [1], [0, 0, 1, 1], [], []>} : vector<112x4xf32>, vector<4x128xf32>, vector<112x128xf32> -> vector<112x128xf32>
    %24 = arith.addf %18, %23 : vector<112x128xf32>
    %c0_22 = arith.constant 0 : index
    %c8_23 = arith.constant 8 : index
    %c4_24 = arith.constant 4 : index
    %25 = vector.load %arg1[%c0_22, %c8_23, %c4_24] : memref<1x136x8xf32, #tpu.memory_space<vmem>>, vector<1x112x4xf32>
    %26 = vector.shape_cast %25 : vector<1x112x4xf32> to vector<112x4xf32>
    %c4_25 = arith.constant 4 : index
    %c0_26 = arith.constant 0 : index
    %c0_27 = arith.constant 0 : index
    %27 = vector.load %arg2[%c4_25, %c0_26, %c0_27] : memref<9x4x128xf32, #tpu.memory_space<vmem>>, vector<1x4x128xf32>
    %28 = vector.shape_cast %27 : vector<1x4x128xf32> to vector<4x128xf32>
    %cst_28 = arith.constant dense<0.000000e+00> : vector<112x128xf32>
    %29 = tpu.matmul %26, %28, %cst_28 {dimension_numbers = #tpu.dot_dimension_numbers<[1], [0], [0], [1], [0, 0, 1, 1], [], []>} : vector<112x4xf32>, vector<4x128xf32>, vector<112x128xf32> -> vector<112x128xf32>
    %30 = arith.addf %24, %29 : vector<112x128xf32>
    %c0_29 = arith.constant 0 : index
    %c9 = arith.constant 9 : index
    %c0_30 = arith.constant 0 : index
    %31 = vector.load %arg1[%c0_29, %c9, %c0_30] : memref<1x136x8xf32, #tpu.memory_space<vmem>>, vector<1x112x4xf32>
    %32 = vector.shape_cast %31 : vector<1x112x4xf32> to vector<112x4xf32>
    %c5 = arith.constant 5 : index
    %c0_31 = arith.constant 0 : index
    %c0_32 = arith.constant 0 : index
    %33 = vector.load %arg2[%c5, %c0_31, %c0_32] : memref<9x4x128xf32, #tpu.memory_space<vmem>>, vector<1x4x128xf32>
    %34 = vector.shape_cast %33 : vector<1x4x128xf32> to vector<4x128xf32>
    %cst_33 = arith.constant dense<0.000000e+00> : vector<112x128xf32>
    %35 = tpu.matmul %32, %34, %cst_33 {dimension_numbers = #tpu.dot_dimension_numbers<[1], [0], [0], [1], [0, 0, 1, 1], [], []>} : vector<112x4xf32>, vector<4x128xf32>, vector<112x128xf32> -> vector<112x128xf32>
    %36 = arith.addf %30, %35 : vector<112x128xf32>
    %c0_34 = arith.constant 0 : index
    %c16 = arith.constant 16 : index
    %c0_35 = arith.constant 0 : index
    %37 = vector.load %arg1[%c0_34, %c16, %c0_35] : memref<1x136x8xf32, #tpu.memory_space<vmem>>, vector<1x112x4xf32>
    %38 = vector.shape_cast %37 : vector<1x112x4xf32> to vector<112x4xf32>
    %c6 = arith.constant 6 : index
    %c0_36 = arith.constant 0 : index
    %c0_37 = arith.constant 0 : index
    %39 = vector.load %arg2[%c6, %c0_36, %c0_37] : memref<9x4x128xf32, #tpu.memory_space<vmem>>, vector<1x4x128xf32>
    %40 = vector.shape_cast %39 : vector<1x4x128xf32> to vector<4x128xf32>
    %cst_38 = arith.constant dense<0.000000e+00> : vector<112x128xf32>
    %41 = tpu.matmul %38, %40, %cst_38 {dimension_numbers = #tpu.dot_dimension_numbers<[1], [0], [0], [1], [0, 0, 1, 1], [], []>} : vector<112x4xf32>, vector<4x128xf32>, vector<112x128xf32> -> vector<112x128xf32>
    %42 = arith.addf %36, %41 : vector<112x128xf32>
    %c0_39 = arith.constant 0 : index
    %c16_40 = arith.constant 16 : index
    %c4_41 = arith.constant 4 : index
    %43 = vector.load %arg1[%c0_39, %c16_40, %c4_41] : memref<1x136x8xf32, #tpu.memory_space<vmem>>, vector<1x112x4xf32>
    %44 = vector.shape_cast %43 : vector<1x112x4xf32> to vector<112x4xf32>
    %c7 = arith.constant 7 : index
    %c0_42 = arith.constant 0 : index
    %c0_43 = arith.constant 0 : index
    %45 = vector.load %arg2[%c7, %c0_42, %c0_43] : memref<9x4x128xf32, #tpu.memory_space<vmem>>, vector<1x4x128xf32>
    %46 = vector.shape_cast %45 : vector<1x4x128xf32> to vector<4x128xf32>
    %cst_44 = arith.constant dense<0.000000e+00> : vector<112x128xf32>
    %47 = tpu.matmul %44, %46, %cst_44 {dimension_numbers = #tpu.dot_dimension_numbers<[1], [0], [0], [1], [0, 0, 1, 1], [], []>} : vector<112x4xf32>, vector<4x128xf32>, vector<112x128xf32> -> vector<112x128xf32>
    %48 = arith.addf %42, %47 : vector<112x128xf32>
    %c0_45 = arith.constant 0 : index
    %c17 = arith.constant 17 : index
    %c0_46 = arith.constant 0 : index
    %49 = vector.load %arg1[%c0_45, %c17, %c0_46] : memref<1x136x8xf32, #tpu.memory_space<vmem>>, vector<1x112x4xf32>
    %50 = vector.shape_cast %49 : vector<1x112x4xf32> to vector<112x4xf32>
    %c8_47 = arith.constant 8 : index
    %c0_48 = arith.constant 0 : index
    %c0_49 = arith.constant 0 : index
    %51 = vector.load %arg2[%c8_47, %c0_48, %c0_49] : memref<9x4x128xf32, #tpu.memory_space<vmem>>, vector<1x4x128xf32>
    %52 = vector.shape_cast %51 : vector<1x4x128xf32> to vector<4x128xf32>
    %cst_50 = arith.constant dense<0.000000e+00> : vector<112x128xf32>
    %53 = tpu.matmul %50, %52, %cst_50 {dimension_numbers = #tpu.dot_dimension_numbers<[1], [0], [0], [1], [0, 0, 1, 1], [], []>} : vector<112x4xf32>, vector<4x128xf32>, vector<112x128xf32> -> vector<112x128xf32>
    %54 = arith.addf %48, %53 : vector<112x128xf32>
    %55 = tpu.iota {dimensions = array<i32: 0>} : vector<112x1xi32>
    %c8_i32 = arith.constant 8 : i32
    %c0_i32 = arith.constant 0 : i32
    %56 = arith.cmpi eq, %c8_i32, %c0_i32 : i32
    %c1_i32 = arith.constant 1 : i32
    %57 = arith.select %56, %c1_i32, %c8_i32 : i32
    %58 = vector.broadcast %57 : i32 to vector<112x1xi32>
    %59 = arith.remsi %55, %58 : vector<112x1xi32>
    %c0_i32_51 = arith.constant 0 : i32
    %60 = vector.broadcast %c0_i32_51 : i32 to vector<112x1xi32>
    %61 = arith.cmpi ne, %59, %60 : vector<112x1xi32>
    %c0_i32_52 = arith.constant 0 : i32
    %62 = vector.broadcast %c0_i32_52 : i32 to vector<112x1xi32>
    %63 = arith.cmpi slt, %59, %62 : vector<112x1xi32>
    %c0_i32_53 = arith.constant 0 : i32
    %64 = arith.cmpi slt, %57, %c0_i32_53 : i32
    %65 = vector.broadcast %64 : i1 to vector<112x1xi1>
    %66 = vector.broadcast %65 : vector<112x1xi1> to vector<112x1xi1>
    %67 = arith.xori %63, %66 : vector<112x1xi1>
    %68 = arith.andi %67, %61 : vector<112x1xi1>
    %69 = vector.broadcast %57 : i32 to vector<112x1xi32>
    %70 = arith.addi %59, %69 : vector<112x1xi32>
    %71 = arith.select %68, %70, %59 : vector<112x1xi1>, vector<112x1xi32>
    %c7_i32 = arith.constant 7 : i32
    %72 = vector.broadcast %c7_i32 : i32 to vector<112x1xi32>
    %73 = arith.cmpi slt, %71, %72 : vector<112x1xi32>
    %cst_54 = arith.constant 0.000000e+00 : f32
    %74 = vector.shape_cast %73 : vector<112x1xi1> to vector<112x1xi1>
    %75 = vector.broadcast %74 : vector<112x1xi1> to vector<112x128xi1>
    %76 = vector.broadcast %cst_54 : f32 to vector<112x128xf32>
    %77 = arith.select %75, %54, %76 : vector<112x128xi1>, vector<112x128xf32>
    %cst_55 = arith.constant dense<0.000000e+00> : vector<128xf32>
    %78 = vector.multi_reduction <add>, %77, %cst_55 [0] : vector<112x128xf32> to vector<128xf32>
    %79 = vector.shape_cast %78 : vector<128xf32> to vector<1x128xf32>
    %c0_56 = arith.constant 0 : index
    %c0_57 = arith.constant 0 : index
    %c0_58 = arith.constant 0 : index
    %80 = vector.load %arg3[%c0_56, %c0_57, %c0_58] : memref<1x2x128xf32, #tpu.memory_space<vmem>>, vector<1x1x128xf32>
    %81 = vector.shape_cast %80 : vector<1x1x128xf32> to vector<1x128xf32>
    %82 = vector.shape_cast %79 : vector<1x128xf32> to vector<1x1x128xf32>
    tpu.vector_store %arg3[%c0_56, %c0_57, %c0_58], %82 {strides = array<i32>} : memref<1x2x128xf32, #tpu.memory_space<vmem>>, vector<1x1x128xf32>,
    %83 = arith.mulf %77, %77 : vector<112x128xf32>
    %cst_59 = arith.constant dense<0.000000e+00> : vector<128xf32>
    %84 = vector.multi_reduction <add>, %83, %cst_59 [0] : vector<112x128xf32> to vector<128xf32>
    %85 = vector.shape_cast %84 : vector<128xf32> to vector<1x128xf32>
    %c0_60 = arith.constant 0 : index
    %c1_61 = arith.constant 1 : index
    %c0_62 = arith.constant 0 : index
    %86 = vector.load %arg3[%c0_60, %c1_61, %c0_62] : memref<1x2x128xf32, #tpu.memory_space<vmem>>, vector<1x1x128xf32>
    %87 = vector.shape_cast %86 : vector<1x1x128xf32> to vector<1x128xf32>
    %88 = vector.shape_cast %85 : vector<1x128xf32> to vector<1x1x128xf32>
    tpu.vector_store %arg3[%c0_60, %c1_61, %c0_62], %88 {strides = array<i32>} : memref<1x2x128xf32, #tpu.memory_space<vmem>>, vector<1x1x128xf32>,
    return
  }
  func.func @transform_0(%arg0: i32) -> (i32, i32, i32) {
    %c0_i32 = arith.constant 0 : i32
    %c0_i32_0 = arith.constant 0 : i32
    %c0_i32_1 = arith.constant 0 : i32
    return %arg0, %c0_i32, %c0_i32_0 : i32, i32, i32
  }
  func.func @transform_1(%arg0: i32) -> (i32, i32, i32) {
    %c0_i32 = arith.constant 0 : i32
    %c0_i32_0 = arith.constant 0 : i32
    %c0_i32_1 = arith.constant 0 : i32
    %c0_i32_2 = arith.constant 0 : i32
    return %c0_i32, %c0_i32_0, %c0_i32_1 : i32, i32, i32
  }
  func.func @transform_2(%arg0: i32) -> (i32, i32, i32) {
    %c0_i32 = arith.constant 0 : i32
    %c0_i32_0 = arith.constant 0 : i32
    %c0_i32_1 = arith.constant 0 : i32
    return %arg0, %c0_i32, %c0_i32_0 : i32, i32, i32
  }
}

</mosaic_0001>

<bundles_post_ra>
// kernel: tpu_custom_call.1
= control target key start
LH: loop header
LB: loop body
LE: loop exit
PB: predicated region body
PF: predicated region fallthrough
CT: control target
= control target key end

     0   :  { %7 = vsyncpa [#allocation3], 0  ;;  %s3693_s0 = inlined_call_operand.vmem [shape: f32[2,136,8], index: 0, kind: input, shape index: {}]   ;;  %s3694_s1 = inlined_call_operand.vmem [shape: f32[9,4,128], index: 1, kind: input, shape index: {}]   ;;  %s3695_s2 = inlined_call_operand.hbm [shape: f32[2,2,128], index: 2, kind: output, shape index: {}]  }
   0x1   :  { %9 = vsyncpa [#allocation3 + $0x1], 0  ;;  %s3102_s9 = smov 0   ;;  %s3104_s10 = smov 0  }
   0x2   :  { %s3106_s11 = smov 0   ;;  %s3108_s12 = smov 0  }
   0x3 LB: > { %s3123_s13 = sadd.s32 4294967295, %s3083_s12   ;;  %s2371_s14 = sadd.s32 4294967294, %s3083_s12   ;;  %s3083_s12 = sphi %s3108_s12, %s3709_s12   ;;  %s3079_s11 = sphi %s3106_s11, %s3708_s11   ;;  %s3075_s10 = sphi %s3104_s10, %s3707_s10   ;;  %s3071_s9 = sphi %s3102_s9, %s3706_s9  }
   0x4   : > { %s3127_s15 = sadd.s32 1, %s3083_s12   ;;  %s69_s16 = sadd.s32 1, %s3079_s11 }
   0x5   : > { %s66_s17 = ssub.s32 %s3083_s12, %s3127_s15  ;;  %p79_p0 = scmp.ne.s32.totalorder %s3079_s11, %s3075_s10 }
   0x6   : > { %p67_p1 = scmp.eq.s32.totalorder %s66_s17, 0  ;;  %p80_p2 = scmp.eq.s32.totalorder %s3123_s13, 1 }
   0x7   : > { %p85_p3 = scmp.ne.s32.totalorder %s3075_s10, %s3071_s9  ;;  %p86_p4 = scmp.eq.s32.totalorder %s2371_s14, 1 }
   0x8   : > { %s3138_s18 = scalar_select %p67_p1, %s3079_s11, %s69_s16  }
   0x9   : > { %p3140_p5 = por %p80_p2, %p79_p0  ;;  %p3144_p6 = por %p86_p4, %p85_p3 }
   0xa   : > { %p2374_p7 = scmp.ge.s32.totalorder %s3083_s12, 1  ;;  %p115_p8 = scmp.lt.s32.totalorder %s3083_s12, 3 }
   0xc   : > { %p116_p9 = pnand %p2374_p7, %p115_p8 }
   0xd   : > { %p137_p10 = scmp.lt.s32.totalorder (!%p116_p9), %s3123_s13, 1  ;;  %vm230_vm0 = vcmask (!%p116_p9), 1043456   ;;  %v3154_v0 = vld [vmem:[%s3694_s1 + $0x10] sm:$0xf] (!%p116_p9)  ;;  %v2377_v1 = vld [vmem:[%s3694_s1 + $0x4] sm:$0xf] (!%p116_p9) }
   0xe   : > { %119 = sbr.rel (%p116_p9) target bundleno = 527 (0x20f), region = 28  ;;  %2751 = vmatprep.subr.msk.mxu0 (!%p116_p9), %vm230_vm0, %v3154_v0  ;;  %2659 = vmatprep.subr.msk.mxu1 (!%p116_p9), %vm230_vm0, %v2377_v1  ;;  %s3085_s30 = smov (!%p116_p9), 124   ;;  %v3197_v7 = vld [vmem:[%s3694_s1 + $0x14] sm:$0xf] (!%p116_p9)  ;;  %v3202_v8 = vld [vmem:[%s3694_s1] sm:$0xf] (!%p116_p9) }
   0xf   : > { %2752 = vmatpush3.msk.msra.mxu0 (!%p116_p9), %vm230_vm0, %v3154_v0  ;;  %2660 = vmatpush3.msk.msra.mxu1 (!%p116_p9), %vm230_vm0, %v2377_v1  ;;  %vm201_vm1 = vcmask (!%p116_p9), 31744   ;;  %v2472_v24 = vld [vmem:[%s3694_s1 + $0x18] sm:$0xf] (!%p116_p9)  ;;  %v3330_v27 = vld [vmem:[%s3694_s1 + $0x8] sm:$0xf] (!%p116_p9)  ;;  %s2521_s28 = sshll.u32 (!%p116_p9), %s3123_s13, 5 }
  0x10   : > { %2774 = vmatprep.subr.msk.mxu0 (!%p116_p9), %vm230_vm0, %v3197_v7  ;;  %2682 = vmatprep.subr.msk.mxu1 (!%p116_p9), %vm230_vm0, %v3202_v8  ;;  %v2488_v41 = vld [vmem:[%s3694_s1 + $0x1c] sm:$0xf] (!%p116_p9)  ;;  %v2424_v56 = vld [vmem:[%s3694_s1 + $0xc] sm:$0xf] (!%p116_p9)  ;;  %v2504_v60 = vld [vmem:[%s3694_s1 + $0x20] sm:$0xf] (!%p116_p9)  ;;  %s3651_s5 = scalar_lea.hbm (!%p116_p9), %s3695_s2, %s2521_s28 }
  0x15   : > { %s138_s25 = scalar_select %p137_p10, %s3123_s13, 1 }
  0x16   : > { %s3086_s13 = smov [#allocation2]  }
  0x17   : > { %s2980_s26 = smul.u32 136, %s138_s25  ;;  %s3025_s8 = sshll.u32 %s3086_s13, 4  ;;  %s3026_s8 = int_to_ptr.vmem [resolvable:$false] %s3025_s8 }
  0x18   : > { %s3027_s14 = scalar_lea.vmem %s3026_s8, 64 }
  0x19   : > { %s3169_s29 = scalar_lea.vmem %s3693_s0, %s2980_s26  ;;  %s134_s26 = sand.u32 1, %s3075_s10  }
  0x1a   : > { %v3172_v2 = vld [vmem:[%s3169_s29 + $0x8] sm:$0xff]  ;;  %v3175_v3 = vld [vmem:[%s3169_s29] sm:$0xff]  ;;  %v3182_v4 = vld [vmem:[%s3169_s29 + $0x10] sm:$0xff]  ;;  %s2375_s27 = sshll.u32 %s134_s26, 1  ;;  %s2299_s6 = scalar_lea.sflag [#allocation3], %s134_s26 }
  0x1b   : > { %957 = vrot.lane.b32.xlu0 %v3172_v2, %s3085_s30  ;;  %173 = vrot.lane.b32.xlu1 %v3175_v3, %s3085_s30  ;;  %v3185_v5 = vld [vmem:[%s3169_s29 + $0x18] sm:$0xff]  ;;  %v3192_v6 = vld [vmem:[%s3169_s29 + $0x20] sm:$0xff] }
  0x1c   : > { %v3213_v9 = vld [vmem:[%s3169_s29 + $0x28] sm:$0xff]  ;;  %v3220_v10 = vld [vmem:[%s3169_s29 + $0x30] sm:$0xff]  ;;  %v3227_v11 = vld [vmem:[%s3169_s29 + $0x38] sm:$0xff] }
  0x1d   : > { %v3234_v12 = vld [vmem:[%s3169_s29 + $0x40] sm:$0xff]  ;;  %v3245_v13 = vld [vmem:[%s3169_s29 + $0x48] sm:$0xff]  ;;  %v3252_v14 = vld [vmem:[%s3169_s29 + $0x50] sm:$0xff] }
  0x1e   : > { %v3255_v15 = vld [vmem:[%s3169_s29 + $0x58] sm:$0xff]  ;;  %v3262_v16 = vld [vmem:[%s3169_s29 + $0x60] sm:$0xff]  ;;  %v3265_v17 = vld [vmem:[%s3169_s29 + $0x68] sm:$0xff] }
  0x1f   : > { %959 = vrot.lane.b32.xlu0 %v3182_v4, %s3085_s30  ;;  %961 = vrot.lane.b32.xlu1 %v3185_v5, %s3085_s30  ;;  %v3296_v18 = vld [vmem:[%s3169_s29 + $0x70] sm:$0xff]  ;;  %v3299_v19 = vld [vmem:[%s3169_s29 + $0x78] sm:$0xff] }
  0x20   : > { %v3345_v34 = vld [vmem:[%s3169_s29 + $0x9] sm:$0xff]  ;;  %v3352_v37 = vld [vmem:[%s3169_s29 + $0x11] sm:$0xff]  ;;  %v3355_v40 = vld [vmem:[%s3169_s29 + $0x19] sm:$0xff] }
  0x21   : > { %v3366_v42 = vld [vmem:[%s3169_s29 + $0x21] sm:$0xff]  ;;  %v3371_v43 = vld [vmem:[%s3169_s29 + $0x29] sm:$0xff]  ;;  %v3381_v46 = vld [vmem:[%s3169_s29 + $0x31] sm:$0xff] }
  0x22   : > { %v3384_v47 = vld [vmem:[%s3169_s29 + $0x39] sm:$0xff]  ;;  %v3393_v50 = vld [vmem:[%s3169_s29 + $0x41] sm:$0xff]  ;;  %v3396_v51 = vld [vmem:[%s3169_s29 + $0x49] sm:$0xff] }
  0x23   : > { %175 = vrot.lane.b32.xlu0 %v3172_v2, %s3085_s30  ;;  %963 = vrot.lane.b32.xlu1 %v3192_v6, %s3085_s30  ;;  %v3405_v54 = vld [vmem:[%s3169_s29 + $0x51] sm:$0xff]  ;;  %v3410_v55 = vld [vmem:[%s3169_s29 + $0x59] sm:$0xff] }
  0x24   : > { %v3422_v57 = vld [vmem:[%s3169_s29 + $0x61] sm:$0xff]  ;;  %v3429_v58 = vld [vmem:[%s3169_s29 + $0x69] sm:$0xff]  ;;  %v3439_v59 = vld [vmem:[%s3169_s29 + $0x71] sm:$0xff] }
  0x25   : > { %v535_v62 = vld [vmem:[%s3169_s29 + $0x1] sm:$0xff] }
  0x27   : > { %177 = vrot.lane.b32.xlu0 %v3182_v4, %s3085_s30  ;;  %965 = vrot.lane.b32.xlu1 %v3213_v9, %s3085_s30 }
  0x2b   : > { %179 = vrot.lane.b32.xlu0 %v3185_v5, %s3085_s30  ;;  %967 = vrot.lane.b32.xlu1 %v3220_v10, %s3085_s30 }
  0x2f   : > { %181 = vrot.lane.b32.xlu0 %v3192_v6, %s3085_s30  ;;  %969 = vrot.lane.b32.xlu1 %v3227_v11, %s3085_s30 }
  0x33   : > { %183 = vrot.lane.b32.xlu0 %v3213_v9, %s3085_s30  ;;  %971 = vrot.lane.b32.xlu1 %v3234_v12, %s3085_s30 }
  0x37   : > { %185 = vrot.lane.b32.xlu0 %v3220_v10, %s3085_s30  ;;  %187 = vrot.lane.b32.xlu1 %v3227_v11, %s3085_s30 }
  0x3b   : > { %189 = vrot.lane.b32.xlu0 %v3234_v12, %s3085_s30  ;;  %191 = vrot.lane.b32.xlu1 %v3245_v13, %s3085_s30 }
  0x3f   : > { %193 = vrot.lane.b32.xlu0 %v3252_v14, %s3085_s30  ;;  %195 = vrot.lane.b32.xlu1 %v3255_v15, %s3085_s30 }
  0x43   : > { %197 = vrot.lane.b32.xlu0 %v3262_v16, %s3085_s30  ;;  %199 = vrot.lane.b32.xlu1 %v3265_v17, %s3085_s30 }
  0x47   : > { %1587 = vrot.lane.b32.xlu0 %v3182_v4, %s3085_s30  ;;  %1589 = vrot.lane.b32.xlu1 %v3185_v5, %s3085_s30 }
  0x4b   : > { %1591 = vrot.lane.b32.xlu0 %v3192_v6, %s3085_s30  ;;  %1593 = vrot.lane.b32.xlu1 %v3213_v9, %s3085_s30 }
  0x4f   : > { %1595 = vrot.lane.b32.xlu0 %v3220_v10, %s3085_s30  ;;  %1597 = vrot.lane.b32.xlu1 %v3227_v11, %s3085_s30 }
  0x53   : > { %1599 = vrot.lane.b32.xlu0 %v3234_v12, %s3085_s30  ;;  %1601 = vrot.lane.b32.xlu1 %v3245_v13, %s3085_s30 }
  0x57   : > { %1603 = vrot.lane.b32.xlu0 %v3252_v14, %s3085_s30  ;;  %1605 = vrot.lane.b32.xlu1 %v3255_v15, %s3085_s30 }
  0x5b   : > { %1607 = vrot.lane.b32.xlu0 %v3262_v16, %s3085_s30  ;;  %1609 = vrot.lane.b32.xlu1 %v3265_v17, %s3085_s30 }
  0x5f   : > { %1611 = vrot.lane.b32.xlu0 %v3296_v18, %s3085_s30  ;;  %1613 = vrot.lane.b32.xlu1 %v3299_v19, %s3085_s30 }
  0x63   : > { %973 = vrot.lane.b32.xlu0 %v3245_v13, %s3085_s30  ;;  %975 = vrot.lane.b32.xlu1 %v3252_v14, %s3085_s30 }
  0x67   : > { %977 = vrot.lane.b32.xlu0 %v3255_v15, %s3085_s30  ;;  %979 = vrot.lane.b32.xlu1 %v3262_v16, %s3085_s30 }
  0x6b   : > { %981 = vrot.lane.b32.xlu0 %v3265_v17, %s3085_s30  ;;  %983 = vrot.lane.b32.xlu1 %v3296_v18, %s3085_s30 }
  0x8d   : > { %v958_v20 = vpop.permute.xlu0 %957  ;;  %v174_v21 = vpop.permute.xlu1 %173 }
  0x8e   : > { %2753 = vmatprep.mubr.msk.f32.mxu0 %vm201_vm1, %v958_v20  ;;  %2661 = vmatprep.mubr.msk.f32.mxu1 %vm201_vm1, %v174_v21 }
  0x91   : > { %v960_v22 = vpop.permute.xlu0 %959  ;;  %v962_v23 = vpop.permute.xlu1 %961 }
  0x92   : > { %2754 = vmatmul.mubr.msk.f32.vlgmr.msra.gmra.mrb[0].mxu0 %vm201_vm1, %v960_v22 }
  0x93   : > { %2756 = vmatprep.mubr.msk.f32.mxu0 %vm201_vm1, %v962_v23  ;;  %2775 = vmatpush3.msk.msra.mxu0 %vm230_vm0, %v3197_v7 }
  0x94   : > { %2797 = vmatprep.subr.msk.mxu0 %vm230_vm0, %v2472_v24 }
  0x95   : > { %v176_v25 = vpop.permute.xlu0 %175  ;;  %v964_v26 = vpop.permute.xlu1 %963 }
  0x96   : > { %2662 = vmatmul.mubr.msk.f32.vlgmr.msra.gmra.mrb[0].mxu1 %vm201_vm1, %v176_v25  ;;  %2757 = vmatmul.mubr.msk.f32.gmra.mrb[2].mxu0 %vm201_vm1, %v964_v26 }
  0x97   : > { %2683 = vmatpush3.msk.msra.mxu1 %vm230_vm0, %v3202_v8 }
  0x98   : > { %2705 = vmatprep.subr.msk.mxu1 %vm230_vm0, %v3330_v27 }
  0x99   : > { %v178_v28 = vpop.permute.xlu0 %177  ;;  %v966_v29 = vpop.permute.xlu1 %965 }
  0x9a   : > { %2664 = vmatprep.mubr.msk.f32.mxu1 %vm201_vm1, %v178_v28  ;;  %2759 = vmatprep.mubr.msk.f32.mxu0 %vm201_vm1, %v966_v29 }
  0x9d   : > { %v180_v30 = vpop.permute.xlu0 %179  ;;  %v968_v31 = vpop.permute.xlu1 %967 }
  0x9e   : > { %2665 = vmatmul.mubr.msk.f32.gmra.mrb[2].mxu1 %vm201_vm1, %v180_v30  ;;  %2760 = vmatmul.mubr.msk.f32.gmra.mrb[4].mxu0 %vm201_vm1, %v968_v31 }
  0xa1   : > { %v182_v32 = vpop.permute.xlu0 %181  ;;  %v970_v33 = vpop.permute.xlu1 %969 }
  0xa2   : > { %2667 = vmatprep.mubr.msk.f32.mxu1 %vm201_vm1, %v182_v32  ;;  %2762 = vmatprep.mubr.msk.f32.mxu0 %vm201_vm1, %v970_v33 }
  0xa5   : > { %v184_v35 = vpop.permute.xlu0 %183  ;;  %v972_v36 = vpop.permute.xlu1 %971 }
  0xa6   : > { %2668 = vmatmul.mubr.msk.f32.gmra.mrb[4].mxu1 %vm201_vm1, %v184_v35  ;;  %2763 = vmatmul.mubr.msk.f32.gmra.mrb[6].mxu0 %vm201_vm1, %v972_v36 }
  0xa7   : > { %2776 = vmatprep.mubr.msk.f32.mxu0 %vm201_vm1, %v3345_v34 }
  0xa9   : > { %v186_v38 = vpop.permute.xlu0 %185  ;;  %v188_v39 = vpop.permute.xlu1 %187 }
  0xaa   : > { %2670 = vmatprep.mubr.msk.f32.mxu1 %vm201_vm1, %v186_v38  ;;  %2777 = vmatmul.mubr.msk.f32.vlgmr.msra.gmra.mrb[0].mxu0 %vm201_vm1, %v3352_v37 }
  0xab   : > { %2671 = vmatmul.mubr.msk.f32.gmra.mrb[6].mxu1 %vm201_vm1, %v188_v39  ;;  %2798 = vmatpush3.msk.msra.mxu0 %vm230_vm0, %v2472_v24 }
  0xac   : > { %2779 = vmatprep.mubr.msk.f32.mxu0 %vm201_vm1, %v3355_v40  ;;  %2820 = vmatprep.subr.msk.mxu0 %vm230_vm0, %v2488_v41 }
  0xad   : > { %v190_v44 = vpop.permute.xlu0 %189  ;;  %v192_v45 = vpop.permute.xlu1 %191 }
  0xae   : > { %2673 = vmatprep.mubr.msk.f32.mxu1 %vm201_vm1, %v190_v44  ;;  %2780 = vmatmul.mubr.msk.f32.gmra.mrb[2].mxu0 %vm201_vm1, %v3366_v42 }
  0xaf   : > { %2674 = vmatmul.mubr.msk.f32.gmra.mrb[8].mxu1 %vm201_vm1, %v192_v45  ;;  %2782 = vmatprep.mubr.msk.f32.mxu0 %vm201_vm1, %v3371_v43 }
  0xb1   : > { %v194_v48 = vpop.permute.xlu0 %193  ;;  %v196_v49 = vpop.permute.xlu1 %195 }
  0xb2   : > { %2676 = vmatprep.mubr.msk.f32.mxu1 %vm201_vm1, %v194_v48  ;;  %2783 = vmatmul.mubr.msk.f32.gmra.mrb[4].mxu0 %vm201_vm1, %v3381_v46 }
  0xb3   : > { %2677 = vmatmul.mubr.msk.f32.gmra.mrb[10].mxu1 %vm201_vm1, %v196_v49  ;;  %2785 = vmatprep.mubr.msk.f32.mxu0 %vm201_vm1, %v3384_v47 }
  0xb5   : > { %v198_v52 = vpop.permute.xlu0 %197  ;;  %v200_v53 = vpop.permute.xlu1 %199 }
  0xb6   : > { %2679 = vmatprep.mubr.msk.f32.mxu1 %vm201_vm1, %v198_v52  ;;  %2786 = vmatmul.mubr.msk.f32.gmra.mrb[6].mxu0 %vm201_vm1, %v3393_v50 }
  0xb7   : > { %2680 = vmatmul.mubr.msk.f32.gmra.mrb[12].mxu1 %vm201_vm1, %v200_v53  ;;  %2788 = vmatprep.mubr.msk.f32.mxu0 %vm201_vm1, %v3396_v51 }
  0xb8   : > { %2684 = vmatprep.mubr.msk.f32.mxu1 %vm201_vm1, %v3175_v3 }
  0xb9   : > { %v1588_v61 = vpop.permute.xlu0 %1587  ;;  %v1590_v63 = vpop.permute.xlu1 %1589 }
  0xba   : > { %2789 = vmatmul.mubr.msk.f32.gmra.mrb[8].mxu0 %vm201_vm1, %v3405_v54 }
  0xbb   : > { %2685 = vmatmul.mubr.msk.f32.vlgmr.msra.gmra.mrb[0].mxu1 %vm201_vm1, %v3172_v2  ;;  %2791 = vmatprep.mubr.msk.f32.mxu0 %vm201_vm1, %v3410_v55 }
  0xbc   : > { %2706 = vmatpush3.msk.msra.mxu1 %vm230_vm0, %v3330_v27  ;;  %2687 = vmatprep.mubr.msk.f32.mxu1 %vm201_vm1, %v3182_v4 }
  0xbd   : > { %2728 = vmatprep.subr.msk.mxu1 %vm230_vm0, %v2424_v56  ;;  %v1592_v1 = vpop.permute.xlu0 %1591  ;;  %v1594_v3 = vpop.permute.xlu1 %1593 }
  0xbe   : > { %2792 = vmatmul.mubr.msk.f32.gmra.mrb[10].mxu0 %vm201_vm1, %v3422_v57 }
  0xbf   : > { %2688 = vmatmul.mubr.msk.f32.gmra.mrb[2].mxu1 %vm201_vm1, %v3185_v5  ;;  %2794 = vmatprep.mubr.msk.f32.mxu0 %vm201_vm1, %v3429_v58 }
  0xc0   : > { %2690 = vmatprep.mubr.msk.f32.mxu1 %vm201_vm1, %v3192_v6 }
  0xc1   : > { %v1596_v7 = vpop.permute.xlu0 %1595  ;;  %v1598_v8 = vpop.permute.xlu1 %1597 }
  0xc2   : > { %2795 = vmatmul.mubr.msk.f32.gmra.mrb[12].mxu0 %vm201_vm1, %v3439_v59 }
  0xc3   : > { %2691 = vmatmul.mubr.msk.f32.gmra.mrb[4].mxu1 %vm201_vm1, %v3213_v9  ;;  %2799 = vmatprep.mubr.msk.f32.mxu0 %vm201_vm1, %v3182_v4 }
  0xc4   : > { %2693 = vmatprep.mubr.msk.f32.mxu1 %vm201_vm1, %v3220_v10 }
  0xc5   : > { %v1600_v20 = vpop.permute.xlu0 %1599 }
  0xc6   : > { %2800 = vmatmul.mubr.msk.f32.vlgmr.msra.gmra.mrb[0].mxu0 %vm201_vm1, %v3185_v5 }
  0xc7   : > { %2694 = vmatmul.mubr.msk.f32.gmra.mrb[6].mxu1 %vm201_vm1, %v3227_v11  ;;  %2821 = vmatpush3.msk.msra.mxu0 %vm230_vm0, %v2488_v41 }
  0xc8   : > { %2802 = vmatprep.mubr.msk.f32.mxu0 %vm201_vm1, %v3192_v6  ;;  %2696 = vmatprep.mubr.msk.f32.mxu1 %vm201_vm1, %v3234_v12 }
  0xc9   : > { %2843 = vmatprep.subr.msk.mxu0 %vm230_vm0, %v2504_v60  ;;  %v1604_v21 = vpop.permute.xlu0 %1603 }
  0xca   : > { %2803 = vmatmul.mubr.msk.f32.gmra.mrb[2].mxu0 %vm201_vm1, %v3213_v9 }
  0xcb   : > { %2697 = vmatmul.mubr.msk.f32.gmra.mrb[8].mxu1 %vm201_vm1, %v3245_v13  ;;  %2805 = vmatprep.mubr.msk.f32.mxu0 %vm201_vm1, %v3220_v10 }
  0xcc   : > { %2699 = vmatprep.mubr.msk.f32.mxu1 %vm201_vm1, %v3252_v14 }
  0xcd   : > { %v1608_v23 = vpop.permute.xlu0 %1607 }
  0xce   : > { %2806 = vmatmul.mubr.msk.f32.gmra.mrb[4].mxu0 %vm201_vm1, %v3227_v11 }
  0xcf   : > { %2700 = vmatmul.mubr.msk.f32.gmra.mrb[10].mxu1 %vm201_vm1, %v3255_v15  ;;  %2808 = vmatprep.mubr.msk.f32.mxu0 %vm201_vm1, %v3234_v12 }
  0xd0   : > { %2702 = vmatprep.mubr.msk.f32.mxu1 %vm201_vm1, %v3262_v16 }
  0xd1   : > { %v1612_v25 = vpop.permute.xlu0 %1611 }
  0xd2   : > { %2809 = vmatmul.mubr.msk.f32.gmra.mrb[6].mxu0 %vm201_vm1, %v3245_v13 }
  0xd3   : > { %2703 = vmatmul.mubr.msk.f32.gmra.mrb[12].mxu1 %vm201_vm1, %v3265_v17  ;;  %2811 = vmatprep.mubr.msk.f32.mxu0 %vm201_vm1, %v3252_v14 }
  0xd4   : > { %2707 = vmatprep.mubr.msk.f32.mxu1 %vm201_vm1, %v535_v62 }
  0xd6   : > { %2812 = vmatmul.mubr.msk.f32.gmra.mrb[8].mxu0 %vm201_vm1, %v3255_v15 }
  0xd7   : > { %2708 = vmatmul.mubr.msk.f32.vlgmr.msra.gmra.mrb[0].mxu1 %vm201_vm1, %v3345_v34  ;;  %2814 = vmatprep.mubr.msk.f32.mxu0 %vm201_vm1, %v3262_v16 }
  0xd8   : > { %2729 = vmatpush3.msk.msra.mxu1 %vm230_vm0, %v2424_v56  ;;  %2710 = vmatprep.mubr.msk.f32.mxu1 %vm201_vm1, %v3352_v37 }
  0xd9   : > { %2866 = vmatprep.subr.msk.mxu1 %vm230_vm0, %v3154_v0 }
  0xda   : > { %2815 = vmatmul.mubr.msk.f32.gmra.mrb[10].mxu0 %vm201_vm1, %v3265_v17 }
  0xdb   : > { %2711 = vmatmul.mubr.msk.f32.gmra.mrb[2].mxu1 %vm201_vm1, %v3355_v40  ;;  %2817 = vmatprep.mubr.msk.f32.mxu0 %vm201_vm1, %v3296_v18 }
  0xdc   : > { %2713 = vmatprep.mubr.msk.f32.mxu1 %vm201_vm1, %v3366_v42 }
  0xde   : > { %2818 = vmatmul.mubr.msk.f32.gmra.mrb[12].mxu0 %vm201_vm1, %v3299_v19  ;;  %v1602_v19 = vpop.permute.xlu1 %1601 }
  0xdf   : > { %2714 = vmatmul.mubr.msk.f32.gmra.mrb[4].mxu1 %vm201_vm1, %v3371_v43  ;;  %2822 = vmatprep.mubr.msk.f32.mxu0 %vm201_vm1, %v1588_v61 }
  0xe0   : > { %2716 = vmatprep.mubr.msk.f32.mxu1 %vm201_vm1, %v3381_v46 }
  0xe2   : > { %2823 = vmatmul.mubr.msk.f32.vlgmr.msra.gmra.mrb[0].mxu0 %vm201_vm1, %v1590_v63  ;;  %v1606_v22 = vpop.permute.xlu1 %1605 }
  0xe3   : > { %2717 = vmatmul.mubr.msk.f32.gmra.mrb[6].mxu1 %vm201_vm1, %v3384_v47  ;;  %2844 = vmatpush3.msk.msra.mxu0 %vm230_vm0, %v2504_v60 }
  0xe4   : > { %2825 = vmatprep.mubr.msk.f32.mxu0 %vm201_vm1, %v1592_v1  ;;  %2719 = vmatprep.mubr.msk.f32.mxu1 %vm201_vm1, %v3393_v50 }
  0xe6   : > { %2826 = vmatmul.mubr.msk.f32.gmra.mrb[2].mxu0 %vm201_vm1, %v1594_v3  ;;  %v1610_v24 = vpop.permute.xlu1 %1609 }
  0xe7   : > { %2720 = vmatmul.mubr.msk.f32.gmra.mrb[8].mxu1 %vm201_vm1, %v3396_v51  ;;  %2828 = vmatprep.mubr.msk.f32.mxu0 %vm201_vm1, %v1596_v7 }
  0xe8   : > { %2722 = vmatprep.mubr.msk.f32.mxu1 %vm201_vm1, %v3405_v54 }
  0xea   : > { %2829 = vmatmul.mubr.msk.f32.gmra.mrb[4].mxu0 %vm201_vm1, %v1598_v8 }
  0xeb   : > { %2723 = vmatmul.mubr.msk.f32.gmra.mrb[10].mxu1 %vm201_vm1, %v3410_v55  ;;  %2831 = vmatprep.mubr.msk.f32.mxu0 %vm201_vm1, %v1600_v20 }
  0xec   : > { %2725 = vmatprep.mubr.msk.f32.mxu1 %vm201_vm1, %v3422_v57 }
  0xee   : > { %2832 = vmatmul.mubr.msk.f32.gmra.mrb[6].mxu0 %vm201_vm1, %v1602_v19 }
  0xef   : > { %2726 = vmatmul.mubr.msk.f32.gmra.mrb[12].mxu1 %vm201_vm1, %v3429_v58  ;;  %2834 = vmatprep.mubr.msk.f32.mxu0 %vm201_vm1, %v1604_v21 }
  0xf0   : > { %2730 = vmatprep.mubr.msk.f32.mxu1 %vm201_vm1, %v3172_v2  ;;  %v1614_v2 = vpop.permute.xlu1 %1613 }
  0xf2   : > { %2835 = vmatmul.mubr.msk.f32.gmra.mrb[8].mxu0 %vm201_vm1, %v1606_v22 }
  0xf3   : > { %2731 = vmatmul.mubr.msk.f32.vlgmr.msra.gmra.mrb[0].mxu1 %vm201_vm1, %v3182_v4  ;;  %2837 = vmatprep.mubr.msk.f32.mxu0 %vm201_vm1, %v1608_v23 }
  0xf4   : > { %2867 = vmatpush3.msk.msra.mxu1 %vm230_vm0, %v3154_v0  ;;  %2733 = vmatprep.mubr.msk.f32.mxu1 %vm201_vm1, %v3185_v5  ;;  %v974_v0 = vpop.permute.xlu0 %973  ;;  %v976_v4 = vpop.permute.xlu1 %975 }
  0xf6   : > { %2838 = vmatmul.mubr.msk.f32.gmra.mrb[10].mxu0 %vm201_vm1, %v1610_v24 }
  0xf7   : > { %2734 = vmatmul.mubr.msk.f32.gmra.mrb[2].mxu1 %vm201_vm1, %v3192_v6  ;;  %2840 = vmatprep.mubr.msk.f32.mxu0 %vm201_vm1, %v1612_v25 }
  0xf8   : > { %2736 = vmatprep.mubr.msk.f32.mxu1 %vm201_vm1, %v3213_v9  ;;  %v978_v5 = vpop.permute.xlu0 %977  ;;  %v980_v6 = vpop.permute.xlu1 %979 }
  0xfa   : > { %2841 = vmatmul.mubr.msk.f32.gmra.mrb[12].mxu0 %vm201_vm1, %v1614_v2 }
  0xfb   : > { %2737 = vmatmul.mubr.msk.f32.gmra.mrb[4].mxu1 %vm201_vm1, %v3220_v10  ;;  %2845 = vmatprep.mubr.msk.f32.mxu0 %vm201_vm1, %v3352_v37  ;;  %v1808_v10 = vld [vmem:[%s3169_s29 + $0x79] sm:$0xff]  ;;  %s136_s29 = scalar_lea.vmem [#allocation2], %s2375_s27 }
  0xfc   : > { %2739 = vmatprep.mubr.msk.f32.mxu1 %vm201_vm1, %v3227_v11  ;;  %v982_v9 = vpop.permute.xlu0 %981  ;;  %v984_v11 = vpop.permute.xlu1 %983  ;;  %s2312_s30 = sshll.u32 %s136_s29, 4  ;;  %s3653_s30 = int_to_ptr.vmem [resolvable:$true] %s2312_s30 }
  0xfd   : > { %s3021_s7 = scalar_lea.vmem %s3653_s30, 32  ;;  %p3028_p0 = scmp.lt.s32.totalorder %s3653_s30, %s3026_s8 }
  0xfe   : > { %2846 = vmatmul.mubr.msk.f32.vlgmr.msra.gmra.mrb[0].mxu0 %vm201_vm1, %v3355_v40  ;;  %p3022_p11 = scmp.ne.s32.totalorder %s3653_s30, %s3021_s7  ;;  %p3029_p1 = scmp.lt.s32.totalorder %s3027_s14, %s3021_s7 }
  0xff   : > { %2740 = vmatmul.mubr.msk.f32.gmra.mrb[6].mxu1 %vm201_vm1, %v3234_v12  ;;  %2848 = vmatprep.mubr.msk.f32.mxu0 %vm201_vm1, %v3366_v42  ;;  %v2005_v12 = vlaneseq }
 0x100   : > { %2742 = vmatprep.mubr.msk.f32.mxu1 %vm201_vm1, %v3245_v13  ;;  %p3023_p12 = pnand %p3022_p11, %p3140_p5  ;;  %p3030_p2 = por %p3029_p1, %p3028_p0 }
 0x101   : > { %v3606_v13 = vshrl.u32 %v2005_v12, 7 }
 0x102   : > { %2849 = vmatmul.mubr.msk.f32.gmra.mrb[2].mxu0 %vm201_vm1, %v3371_v43  ;;  %p3024_p13 = pneg %p3023_p12 }
 0x103   : > { %2743 = vmatmul.mubr.msk.f32.gmra.mrb[8].mxu1 %vm201_vm1, %v3252_v14  ;;  %2851 = vmatprep.mubr.msk.f32.mxu0 %vm201_vm1, %v3381_v46  ;;  %v2009_v26 = vadd.s32 24, %v3606_v13  ;;  %v2008_v27 = vadd.s32 16, %v3606_v13  ;;  %v2024_v30 = vand.u32 7, %v3606_v13  ;;  %v2011_v35 = vadd.s32 40, %v3606_v13 }
 0x104   : > { %2745 = vmatprep.mubr.msk.f32.mxu1 %vm201_vm1, %v3255_v15  ;;  %v2010_v39 = vadd.s32 32, %v3606_v13  ;;  %v2013_v45 = vadd.s32 56, %v3606_v13  ;;  %v2015_v20 = vadd.s32 72, %v3606_v13  ;;  %v2014_v19 = vadd.s32 64, %v3606_v13  ;;  %p3031_p3 = pnand %p3030_p2, %p3024_p13 }
 0x105   : > { %v2045_v32 = vand.u32 7, %v2009_v26  ;;  %v2038_v33 = vand.u32 7, %v2008_v27  ;;  %vm2188_vm3 = vcmp.lt.s32.totalorder %v2024_v30, 7  ;;  %v2059_v49 = vand.u32 7, %v2011_v35 }
 0x106   : > { %2852 = vmatmul.mubr.msk.f32.gmra.mrb[4].mxu0 %vm201_vm1, %v3384_v47 }
 0x107   : > { %2746 = vmatmul.mubr.msk.f32.gmra.mrb[10].mxu1 %vm201_vm1, %v3262_v16  ;;  %2854 = vmatprep.mubr.msk.f32.mxu0 %vm201_vm1, %v3393_v50  ;;  %v2007_v16 = vadd.s32 8, %v3606_v13  ;;  %vm3614_vm4 = vcmp.lt.s32.totalorder %v2045_v32, 7  ;;  %vm3618_vm5 = vcmp.lt.s32.totalorder %v2038_v33, 7  ;;  %v2012_v50 = vadd.s32 48, %v3606_v13 }
 0x108   : > { %2748 = vmatprep.mubr.msk.f32.mxu1 %vm201_vm1, %v3265_v17  ;;  %vm2193_vm6 = vcmp.lt.s32.totalorder %v2059_v49, 7 }
 0x109   : > { %v2031_v28 = vand.u32 7, %v2007_v16  ;;  %v2066_v62 = vand.u32 7, %v2012_v50  ;;  %v2016_v16 = vadd.s32 80, %v3606_v13 }
 0x10a   : > { %2855 = vmatmul.mubr.msk.f32.gmra.mrb[6].mxu0 %vm201_vm1, %v3396_v51 }
 0x10b   : > { %2749 = vmatmul.mubr.msk.f32.gmra.mrb[12].mxu1 %vm201_vm1, %v3296_v18  ;;  %2857 = vmatprep.mubr.msk.f32.mxu0 %vm201_vm1, %v3405_v54  ;;  %vm2189_vm2 = vcmp.lt.s32.totalorder %v2031_v28, 7  ;;  %vm2194_vm9 = vcmp.lt.s32.totalorder %v2066_v62, 7 }
 0x10c   : > { %2765 = vmatprep.mubr.msk.f32.mxu1 %vm201_vm1, %v974_v0 }
 0x10e   : > { %2858 = vmatmul.mubr.msk.f32.gmra.mrb[8].mxu0 %vm201_vm1, %v3410_v55  ;;  %v2052_v55 = vand.u32 7, %v2010_v39 }
 0x10f   : > { %2766 = vmatmul.mubr.msk.f32.vlgmr.msra.gmra.mrb[8].mxu1 %vm201_vm1, %v976_v4  ;;  %2860 = vmatprep.mubr.msk.f32.mxu0 %vm201_vm1, %v3422_v57  ;;  %v2017_v4 = vadd.s32 88, %v3606_v13 }
 0x110   : > { %2768 = vmatprep.mubr.msk.f32.mxu1 %vm201_vm1, %v978_v5  ;;  %vm2192_vm7 = vcmp.lt.s32.totalorder %v2052_v55, 7 }
 0x111   : > { %v2101_v30 = vand.u32 7, %v2017_v4 }
 0x112   : > { %2861 = vmatmul.mubr.msk.f32.gmra.mrb[10].mxu0 %vm201_vm1, %v3429_v58  ;;  %v2073_v58 = vand.u32 7, %v2013_v45 }
 0x113   : > { %2769 = vmatmul.mubr.msk.f32.gmra.mrb[10].mxu1 %vm201_vm1, %v980_v6  ;;  %2863 = vmatprep.mubr.msk.f32.mxu0 %vm201_vm1, %v3439_v59  ;;  %vm3640_vm12 = vcmp.lt.s32.totalorder %v2101_v30, 7 }
 0x114   : > { %2771 = vmatprep.mubr.msk.f32.mxu1 %vm201_vm1, %v982_v9  ;;  %vm3630_vm8 = vcmp.lt.s32.totalorder %v2073_v58, 7 }
 0x116   : > { %2864 = vmatmul.mubr.msk.f32.gmra.mrb[12].mxu0 %vm201_vm1, %v1808_v10 }
 0x117   : > { %2772 = vmatmul.mubr.msk.f32.gmra.mrb[12].mxu1 %vm201_vm1, %v984_v11 }
 0x1c6   : > { %v2732_v14 = vpop.f32.mrb[0].mxu1 }
 0x1c7   : > { %v872_v15 = vpop.f32.mrb[1].mxu1 }
 0x1ca   : > { %v2735_v17 = vpop.f32.mrb[2].mxu1 }
 0x1cb   : > { %v882_v18 = vpop.f32.mrb[3].mxu1 }
 0x1ce   : > { %v2738_v29 = vpop.f32.mrb[4].mxu1 }
 0x1cf   : > { %v892_v31 = vpop.f32.mrb[5].mxu1 }
 0x1d1   : > { %v2847_v34 = vpop.f32.mrb[0].mxu0 }
 0x1d2   : > { %v2868_v36 = vadd.f32 %v2847_v34, %v2732_v14  ;;  %v2741_v37 = vpop.f32.mrb[6].mxu1  ;;  %v1922_v38 = vpop.f32.mrb[1].mxu0  ;;  %v2087_v14 = vand.u32 7, %v2015_v20 }
 0x1d3   : > { %v2869_v40 = vadd.f32 %v1922_v38, %v872_v15  ;;  %v902_v41 = vpop.f32.mrb[7].mxu1  ;;  %v2080_v15 = vand.u32 7, %v2014_v19 }
 0x1d4   : > { %v2231_v42 = vsel %vm2189_vm2, %v2868_v36, 0.0  ;;  %vm2197_vm10 = vcmp.lt.s32.totalorder %v2087_v14, 7 }
 0x1d5   : > { %v2265_v46 = vmul.f32 %v2231_v42, %v2231_v42  ;;  %v2230_v47 = vsel %vm2188_vm3, %v2869_v40, 0.0  ;;  %v2850_v48 = vpop.f32.mrb[2].mxu0  ;;  %vm2196_vm11 = vcmp.lt.s32.totalorder %v2080_v15, 7  ;;  %v2094_v40 = vand.u32 7, %v2016_v16 }
 0x1d6   : > { %v2244_v51 = vadd.f32 %v2231_v42, %v2230_v47  ;;  %v2264_v52 = vmul.f32 %v2230_v47, %v2230_v47  ;;  %v2870_v53 = vadd.f32 %v2850_v48, %v2735_v17  ;;  %v1932_v54 = vpop.f32.mrb[3].mxu0 }
 0x1d7   : > { %v2871_v56 = vadd.f32 %v1932_v54, %v882_v18  ;;  %vm2198_vm13 = vcmp.lt.s32.totalorder %v2094_v40, 7 }
 0x1d8   : > { %v2278_v57 = vadd.f32 %v2265_v46, %v2264_v52  ;;  %v2233_v59 = vsel %vm3614_vm4, %v2870_v53, 0.0 }
 0x1d9   : > { %v2232_v60 = vsel %vm3618_vm5, %v2871_v56, 0.0  ;;  %v2853_v61 = vpop.f32.mrb[4].mxu0  ;;  %v2267_v21 = vmul.f32 %v2233_v59, %v2233_v59 }
 0x1da   : > { %v2245_v63 = vadd.f32 %v2244_v51, %v2232_v60  ;;  %v2266_v1 = vmul.f32 %v2232_v60, %v2232_v60  ;;  %v2872_v3 = vadd.f32 %v2853_v61, %v2738_v29  ;;  %v1942_v7 = vpop.f32.mrb[5].mxu0 }
 0x1db   : > { %v2873_v8 = vadd.f32 %v1942_v7, %v892_v31  ;;  %v2019_v31 = vadd.s32 104, %v3606_v13 }
 0x1dc   : > { %v2279_v22 = vadd.f32 %v2278_v57, %v2266_v1  ;;  %v2246_v23 = vadd.f32 %v2245_v63, %v2233_v59  ;;  %v2235_v25 = vsel %vm2193_vm6, %v2872_v3, 0.0 }
 0x1dd   : > { %v2234_v2 = vsel %vm2192_vm7, %v2873_v8, 0.0  ;;  %v2856_v0 = vpop.f32.mrb[6].mxu0  ;;  %v2269_v17 = vmul.f32 %v2235_v25, %v2235_v25  ;;  %v2115_v47 = vand.u32 7, %v2019_v31 }
 0x1de   : > { %v2247_v5 = vadd.f32 %v2246_v23, %v2234_v2  ;;  %v2268_v6 = vmul.f32 %v2234_v2, %v2234_v2  ;;  %v2280_v9 = vadd.f32 %v2279_v22, %v2267_v21  ;;  %v2874_v10 = vadd.f32 %v2856_v0, %v2741_v37  ;;  %v1952_v11 = vpop.f32.mrb[7].mxu0 }
 0x1df   : > { %v2875_v12 = vadd.f32 %v1952_v11, %v902_v41  ;;  %v2018_v37 = vadd.s32 96, %v3606_v13  ;;  %vm2201_vm14 = vcmp.lt.s32.totalorder %v2115_v47, 7 }
 0x1e0   : > { %v2281_v18 = vadd.f32 %v2280_v9, %v2268_v6  ;;  %v2248_v26 = vadd.f32 %v2247_v5, %v2235_v25  ;;  %v2237_v27 = vsel %vm3630_vm8, %v2874_v10, 0.0 }
 0x1e1   : > { %v2236_v28 = vsel %vm2194_vm9, %v2875_v12, 0.0  ;;  %v2859_v29 = vpop.f32.mrb[8].mxu0  ;;  %v2271_v41 = vmul.f32 %v2237_v27, %v2237_v27  ;;  %v2108_v52 = vand.u32 7, %v2018_v37 }
 0x1e2   : > { %v2249_v32 = vadd.f32 %v2248_v26, %v2236_v28  ;;  %v2270_v33 = vmul.f32 %v2236_v28, %v2236_v28  ;;  %v2282_v34 = vadd.f32 %v2281_v18, %v2269_v17  ;;  %v2767_v35 = vpop.f32.mrb[8].mxu1  ;;  %v1962_v36 = vpop.f32.mrb[9].mxu0 }
 0x1e3   : > { %v2876_v38 = vadd.f32 %v2859_v29, %v2767_v35  ;;  %v1122_v39 = vpop.f32.mrb[9].mxu1  ;;  %vm2200_vm15 = vcmp.lt.s32.totalorder %v2108_v52, 7 }
 0x1e4   : > { %v2283_v42 = vadd.f32 %v2282_v34, %v2270_v33  ;;  %v2877_v43 = vadd.f32 %v1962_v36, %v1122_v39  ;;  %v2250_v44 = vadd.f32 %v2249_v32, %v2237_v27 }
 0x1e5   : > { %v2862_v45 = vpop.f32.mrb[10].mxu0  ;;  %v2239_v48 = vsel %vm2197_vm10, %v2876_v38, 0.0 }
 0x1e6   : > { %v2238_v49 = vsel %vm2196_vm11, %v2877_v43, 0.0  ;;  %v2284_v50 = vadd.f32 %v2283_v42, %v2271_v41  ;;  %v2770_v51 = vpop.f32.mrb[10].mxu1  ;;  %v1972_v13 = vpop.f32.mrb[11].mxu0  ;;  %v2273_v58 = vmul.f32 %v2239_v48, %v2239_v48 }
 0x1e7   : > { %v2251_v53 = vadd.f32 %v2250_v44, %v2238_v49  ;;  %v2272_v54 = vmul.f32 %v2238_v49, %v2238_v49  ;;  %v2878_v55 = vadd.f32 %v2862_v45, %v2770_v51  ;;  %v1132_v56 = vpop.f32.mrb[11].mxu1 }
 0x1e8   : > { %v2879_v57 = vadd.f32 %v1972_v13, %v1132_v56 }
 0x1e9   : > { %v2285_v59 = vadd.f32 %v2284_v50, %v2272_v54  ;;  %v2252_v60 = vadd.f32 %v2251_v53, %v2239_v48  ;;  %v2865_v61 = vpop.f32.mrb[12].mxu0  ;;  %v2241_v62 = vsel %vm3640_vm12, %v2878_v55, 0.0 }
 0x1ea   : > { %v2240_v63 = vsel %vm2198_vm13, %v2879_v57, 0.0  ;;  %v2773_v1 = vpop.f32.mrb[12].mxu1  ;;  %v1982_v3 = vpop.f32.mrb[13].mxu0  ;;  %v2275_v23 = vmul.f32 %v2241_v62, %v2241_v62 }
 0x1eb   : > { %v2253_v7 = vadd.f32 %v2252_v60, %v2240_v63  ;;  %v2274_v8 = vmul.f32 %v2240_v63, %v2240_v63  ;;  %v2286_v20 = vadd.f32 %v2285_v59, %v2273_v58  ;;  %v2880_v19 = vadd.f32 %v2865_v61, %v2773_v1  ;;  %v1142_v21 = vpop.f32.mrb[13].mxu1 }
 0x1ec   : > { %v2881_v22 = vadd.f32 %v1982_v3, %v1142_v21 }
 0x1ed   : > { %v2287_v24 = vadd.f32 %v2286_v20, %v2274_v8  ;;  %v2254_v25 = vadd.f32 %v2253_v7, %v2241_v62  ;;  %v2243_v2 = vsel %vm2201_vm14, %v2880_v19, 0.0 }
 0x1ee   : > { %v2242_v0 = vsel %vm2200_vm15, %v2881_v22, 0.0  ;;  %v2277_v9 = vmul.f32 %v2243_v2, %v2243_v2 }
 0x1ef   : > { %v2255_v4 = vadd.f32 %v2254_v25, %v2242_v0  ;;  %v2276_v5 = vmul.f32 %v2242_v0, %v2242_v0  ;;  %v2288_v6 = vadd.f32 %v2287_v24, %v2275_v23 }
 0x1f1   : > { %v2256_v10 = vadd.f32 %v2255_v4, %v2243_v2  ;;  %v2289_v11 = vadd.f32 %v2288_v6, %v2276_v5 }
 0x1f3   : > { %v2257_v12 = vrot.slane %v2256_v10, 4  ;;  %v2290_v14 = vadd.f32 %v2289_v11, %v2277_v9 }
 0x1f5   : > { %v2258_v15 = vadd.f32 %v2257_v12, %v2256_v10  ;;  %v2291_v16 = vrot.slane %v2290_v14, 4 }
 0x1f7   : > { %v2259_v17 = vrot.slane %v2258_v15, 2  ;;  %v2292_v18 = vadd.f32 %v2291_v16, %v2290_v14 }
 0x1f9   : > { %v2260_v26 = vadd.f32 %v2259_v17, %v2258_v15  ;;  %v2293_v27 = vrot.slane %v2292_v18, 2 }
 0x1fb   : > { %v2261_v28 = vrot.slane %v2260_v26, 1  ;;  %v2294_v29 = vadd.f32 %v2293_v27, %v2292_v18 }
 0x1fd   : > { %v2262_v30 = vadd.f32 %v2261_v28, %v2260_v26  ;;  %v2295_v31 = vrot.slane %v2294_v29, 1 }
 0x1ff   : > { %2263 = vst [vmem:[%s136_s29] sm:$0x1] %v2262_v30  ;;  %v2296_v32 = vadd.f32 %v2295_v31, %v2294_v29 }
 0x201   : > { %2297 = vst [vmem:[%s136_s29 + $0x1] sm:$0x1] %v2296_v32 }
 0x202   : > { %3034 = shalt.err (!%p3031_p3)
}
 0x203   : > { %s3035_s16 = scalar_lea.hbm %s3651_s5, 32  ;;  %s3039_s22 = scalar_lea.hbm %s3695_s2, 64 }
 0x204   : > { %p3036_p4 = scmp.ne.s32.totalorder %s3651_s5, %s3035_s16  ;;  %p3040_p9 = scmp.lt.u32.totalorder %s3651_s5, %s3695_s2 }
 0x205   : > { %p3041_p10 = scmp.lt.u32.totalorder %s3039_s22, %s3035_s16  ;;  %p3043_p12 = scmp.lt.u32.totalorder %s3035_s16, %s3651_s5 }
 0x206   : > { %p3037_p7 = pnand %p3036_p4, %p3140_p5 }
 0x207   : > { %p3042_p11 = por %p3041_p10, %p3040_p9 }
 0x208   : > { %p3038_p8 = pneg %p3037_p7 }
 0x209   : > { %p3044_p13 = por %p3043_p12, %p3042_p11 }
 0x20b   : > { %p3045_p0 = pnand %p3044_p13, %p3038_p8 }
 0x20d   : > { %3048 = shalt.err (!%p3045_p0)
}
 0x20e   : > { %2981 = dma.vmem_to_hbm [thread:$0]  (%p3140_p5), %s3653_s30, 32, %s3651_s5, %s2299_s6  }
 0x20f PF: > { %p2987_p1 = scmp.ge.s32.totalorder %s3083_s12, 2  ;;  %s2324_s25 = sand.u32 1, %s3071_s9  }
 0x210   : > { %s2325_s26 = scalar_lea.sflag [#allocation3], %s2324_s25 }
 0x211   : > { %p2984_p2 = pnand %p2987_p1, %p3144_p6 }
 0x213   : > { %3066 = dma.done.wait (!%p2984_p2), %s2325_s26, 32  }
 0x214   : > { %3068 = vsyncadd (!%p2984_p2), %s2325_s26, 4294967264  ;;  %p12_p3 = scmp.ge.s32.totalorder %s3127_s15, 4   ;;  %s3706_s9 = smov %s3075_s10 }
 0x215   : > { %s3707_s10 = smov %s3079_s11  ;;  %s3708_s11 = smov %s3138_s18 }
 0x216   : > { %s3709_s12 = smov %s3127_s15  ;;  %14 = sbr.rel (!%p12_p3) target bundleno = 3 (0x3), region = 71 }
 0x21d   :  { %2330 = vsyncpa [#allocation3], 1 }
 0x21e   :  { %2332 = vsyncpa [#allocation3 + $0x1], 1 }

</bundles_post_ra>
